<compile_context>
chip_gen: v5e
topology: v5e:2x2
jax: 0.10.0
libtpu: 0.0.40
codegen_flags: <defaults>
</compile_context>

<pallas_src>
import functools

import jax
import jax.numpy as jnp
from jax import lax
from jax.experimental import pallas as pl
from jax.experimental.pallas import tpu as pltpu


# ----------------------------- MLP kernel -----------------------------------
def mlp_kernel(x_ref, w1_ref, b1_ref, w2_ref, b2_ref, y_ref, n_ref):
    x = x_ref[...]
    h = jnp.dot(x, w1_ref[...], preferred_element_type=jnp.float32) + b1_ref[...]
    h = jnp.maximum(h, 0.0)                                   # ReLU
    y = jnp.dot(h, w2_ref[...], preferred_element_type=jnp.float32) + b2_ref[...]
    y_ref[...] = y.astype(y_ref.dtype)
    # Row squared-norms, hoisted here so the pairwise kernel reads them
    # instead of re-reducing all of Y on every grid step.
    n_ref[...] = jnp.sum(y * y, axis=1, keepdims=True).astype(n_ref.dtype)


def run_mlp(x, w1, b1, w2, b2, *, block_rows=256):
    n, d_in = x.shape
    h1 = w1.shape[1]
    h2 = w2.shape[1]
    tm = min(block_rows, n)
    assert n % tm == 0, (n, tm)
    b1 = b1.reshape(1, h1)
    b2 = b2.reshape(1, h2)
    return pl.pallas_call(
        mlp_kernel,
        out_shape=(
            jax.ShapeDtypeStruct((n, h2), jnp.float32),
            jax.ShapeDtypeStruct((n, 1), jnp.float32),
        ),
        grid_spec=pltpu.PrefetchScalarGridSpec(
            num_scalar_prefetch=0,
            grid=(n // tm,),
            in_specs=[
                pl.BlockSpec((tm, d_in), lambda i: (i, 0)),   # X row block
                pl.BlockSpec((d_in, h1), lambda i: (0, 0)),   # W1 (resident)
                pl.BlockSpec((1, h1), lambda i: (0, 0)),      # b1
                pl.BlockSpec((h1, h2), lambda i: (0, 0)),     # W2
                pl.BlockSpec((1, h2), lambda i: (0, 0)),      # b2
            ],
            out_specs=[
                pl.BlockSpec((tm, h2), lambda i: (i, 0)),     # Y row block
                pl.BlockSpec((tm, 1), lambda i: (i, 0)),      # |Y_i|^2
            ],
        ),
        compiler_params=pltpu.CompilerParams(
            dimension_semantics=("parallel",)),
    )(x, w1, b1, w2, b2)


# ------------------------- pairwise exp-kernel -------------------------------
def expkernel_kernel(yi_ref, yj_ref, nj_ref, a_ref, out_ref, *, neg_inv_e):
    yi = yi_ref[...]                                   # (bm, dY) rows, i-block
    yj = yj_ref[...]                                   # (bn, dY) rows, j-block
    # Gram block (bm, bn): contract last dim of both -> MXU, no transpose.
    s = lax.dot_general(yi, yj, (((1,), (1,)), ((), ())),
                        preferred_element_type=jnp.float32)
    ni = jnp.sum(yi * yi, axis=1, keepdims=True)       # (bm, 1)
    nj = nj_ref[...]                                   # (1, bn), precomputed
    d2 = 1e-6 + ni + nj - 2.0 * s
    d2 = jnp.maximum(d2, 0.0)   # guard sqrt against cancellation-negatives
    a = jnp.exp(jnp.sqrt(d2) * neg_inv_e)
    # Fused sign(A): sign in {-1, 0, 1} and a <= 1, so
    #   clamp(a * sign(A_raw), 0, 10) == where(A_raw > 0, a, 0).
    out_ref[...] = jnp.where(a_ref[...] > 0.0, a, 0.0).astype(out_ref.dtype)


def run_expkernel(y, norms_1n, a_raw, e, *, block_rows=256, block_cols=512):
    n, d_y = y.shape
    bm = min(block_rows, n)
    bn = min(block_cols, n)
    assert n % bm == 0 and n % bn == 0, (n, bm, bn)
    assert bm % 8 == 0 or bm == n, bm
    assert bn % 128 == 0 or bn == n, bn

    kern = functools.partial(expkernel_kernel, neg_inv_e=-1.0 / float(e))

    # Rough double-buffered VMEM footprint; only raise the scoped-VMEM limit
    # when the default would not fit (keeps one tiling valid on v5e/v6e/v7x).
    vmem_est = 2 * 4 * (bm * d_y + bn * d_y + bn + 2 * bm * bn)
    cparams = dict(dimension_semantics=("parallel", "parallel"))
    if vmem_est > 24 * 1024 * 1024:
        cparams["vmem_limit_bytes"] = min(vmem_est + (4 << 20), 48 * 1024 * 1024)

    return pl.pallas_call(
        kern,
        out_shape=jax.ShapeDtypeStruct((n, n), jnp.float32),
        grid_spec=pltpu.PrefetchScalarGridSpec(
            num_scalar_prefetch=0,
            grid=(n // bm, n // bn),
            in_specs=[
                pl.BlockSpec((bm, d_y), lambda i, j: (i, 0)),  # Y rows, block i
                pl.BlockSpec((bn, d_y), lambda i, j: (j, 0)),  # Y rows, block j
                pl.BlockSpec((1, bn), lambda i, j: (0, j)),    # |Y_j|^2 row
                pl.BlockSpec((bm, bn), lambda i, j: (i, j)),   # raw A block
            ],
            out_specs=pl.BlockSpec((bm, bn), lambda i, j: (i, j)),
        ),
        compiler_params=pltpu.CompilerParams(**cparams),
    )(y, y, norms_1n, a_raw)


# ------------------------------ module wrapper --------------------------------
def exp_kernel_forward(x, a_raw, params, e=10.0, *, mlp_block_rows=256,
                       pair_block_rows=256, pair_block_cols=512):
    """ExpKernel.forward: clamp(exp(-dist(mlp(X)) / e) * sign(A), 0, 10)."""
    w1, b1, w2, b2 = params
    y, norms = run_mlp(x, w1, b1, w2, b2, block_rows=mlp_block_rows)
    norms_1n = norms.reshape(1, -1)   # (n,1)->(1,n): pure flatten, no transpose
    return run_expkernel(y, norms_1n, a_raw, e,
                         block_rows=pair_block_rows,
                         block_cols=pair_block_cols)


def reference_forward(x, a_raw, params, e=10.0):
    w1, b1, w2, b2 = params
    y = jnp.maximum(x @ w1 + b1, 0.0) @ w2 + b2
    norms = jnp.sum(y * y, axis=1, keepdims=True)
    d2 = jnp.maximum(1e-6 + norms + norms.T - 2.0 * (y @ y.T), 0.0)
    a = jnp.exp(-jnp.sqrt(d2) / e)
    return jnp.clip(a * jnp.sign(a_raw), 0.0, 10.0)


if __name__ == "__main__":
    # Small synthetic problem: n=512 nodes, d=32 features, layers=[32, 16], e=10.
    # Block sizes chosen below so both kernels run multi-block grids.
    n, d_in, h1, h2 = 512, 32, 32, 16
    key = jax.random.PRNGKey(0)
    kx, ka, k1, k2, k3, k4 = jax.random.split(key, 6)

    X = jax.random.normal(kx, (n, d_in), dtype=jnp.float32)
    A_raw = jax.random.normal(ka, (n, n), dtype=jnp.float32)  # sign taken inside

    # Deterministic "Linear" parameters (uniform, PyTorch-style bound).
    bound1 = 1.0 / (d_in ** 0.5)
    bound2 = 1.0 / (h1 ** 0.5)
    W1 = jax.random.uniform(k1, (d_in, h1), jnp.float32, -bound1, bound1)
    b1 = jax.random.uniform(k2, (h1,), jnp.float32, -bound1, bound1)
    W2 = jax.random.uniform(k3, (h1, h2), jnp.float32, -bound2, bound2)
    b2 = jax.random.uniform(k4, (h2,), jnp.float32, -bound2, bound2)
    params = (W1, b1, W2, b2)

    out = exp_kernel_forward(X, A_raw, params, e=10.0,
                             mlp_block_rows=128,       # 4-step MLP grid
                             pair_block_rows=128,      # 4 x 2 pairwise grid
                             pair_block_cols=256)
    out = jax.block_until_ready(out)

    ref = reference_forward(X, A_raw, params, e=10.0)
    assert out.shape == (n, n)
    assert jnp.allclose(out, ref, atol=5e-4, rtol=1e-4), "mismatch vs reference"

    print("KERNEL_OK")
</pallas_src>

<mosaic_0001>
module attributes {stable_mosaic.version = 11 : i64} {
  func.func @mlp_kernel(%arg0: i32, %arg1: memref<128x32xf32, #tpu.memory_space<vmem>>, %arg2: memref<32x32xf32, #tpu.memory_space<vmem>>, %arg3: memref<1x32xf32, #tpu.memory_space<vmem>>, %arg4: memref<32x16xf32, #tpu.memory_space<vmem>>, %arg5: memref<1x16xf32, #tpu.memory_space<vmem>>, %arg6: memref<128x16xf32, #tpu.memory_space<vmem>>, %arg7: memref<128x1xf32, #tpu.memory_space<vmem>>) attributes {dimension_semantics = [#tpu.dimension_semantics<parallel>], iteration_bounds = array<i64: 4>, scalar_prefetch = 0 : i64, scratch_operands = 0 : i64, tpu.core_type = #tpu.core_type<tc>, window_params = [{transform_indices = @transform_0, window_bounds = array<i64: 128, 32>}, {pipeline_mode = #tpu.pipeline_mode<synchronous>, transform_indices = @transform_1, window_bounds = array<i64: 32, 32>}, {pipeline_mode = #tpu.pipeline_mode<synchronous>, transform_indices = @transform_2, window_bounds = array<i64: 1, 32>}, {pipeline_mode = #tpu.pipeline_mode<synchronous>, transform_indices = @transform_3, window_bounds = array<i64: 32, 16>}, {pipeline_mode = #tpu.pipeline_mode<synchronous>, transform_indices = @transform_4, window_bounds = array<i64: 1, 16>}, {transform_indices = @transform_5, window_bounds = array<i64: 128, 16>}, {transform_indices = @transform_6, window_bounds = array<i64: 128, 1>}]} {
    %c0 = arith.constant 0 : index
    %c0_0 = arith.constant 0 : index
    %0 = vector.load %arg1[%c0, %c0_0] : memref<128x32xf32, #tpu.memory_space<vmem>>, vector<128x32xf32>
    %c0_1 = arith.constant 0 : index
    %c0_2 = arith.constant 0 : index
    %1 = vector.load %arg2[%c0_1, %c0_2] : memref<32x32xf32, #tpu.memory_space<vmem>>, vector<32x32xf32>
    %cst = arith.constant dense<0.000000e+00> : vector<128x32xf32>
    %2 = tpu.matmul %0, %1, %cst {dimension_numbers = #tpu.dot_dimension_numbers<[1], [0], [0], [1], [0, 0, 1, 1], [], []>} : vector<128x32xf32>, vector<32x32xf32>, vector<128x32xf32> -> vector<128x32xf32>
    %c0_3 = arith.constant 0 : index
    %c0_4 = arith.constant 0 : index
    %3 = vector.load %arg3[%c0_3, %c0_4] : memref<1x32xf32, #tpu.memory_space<vmem>>, vector<1x32xf32>
    %4 = vector.broadcast %3 : vector<1x32xf32> to vector<128x32xf32>
    %5 = arith.addf %2, %4 : vector<128x32xf32>
    %cst_5 = arith.constant 0.000000e+00 : f32
    %6 = vector.broadcast %cst_5 : f32 to vector<128x32xf32>
    %7 = arith.maximumf %5, %6 : vector<128x32xf32>
    %c0_6 = arith.constant 0 : index
    %c0_7 = arith.constant 0 : index
    %8 = vector.load %arg4[%c0_6, %c0_7] : memref<32x16xf32, #tpu.memory_space<vmem>>, vector<32x16xf32>
    %cst_8 = arith.constant dense<0.000000e+00> : vector<128x16xf32>
    %9 = tpu.matmul %7, %8, %cst_8 {dimension_numbers = #tpu.dot_dimension_numbers<[1], [0], [0], [1], [0, 0, 1, 1], [], []>} : vector<128x32xf32>, vector<32x16xf32>, vector<128x16xf32> -> vector<128x16xf32>
    %c0_9 = arith.constant 0 : index
    %c0_10 = arith.constant 0 : index
    %10 = vector.load %arg5[%c0_9, %c0_10] : memref<1x16xf32, #tpu.memory_space<vmem>>, vector<1x16xf32>
    %11 = vector.broadcast %10 : vector<1x16xf32> to vector<128x16xf32>
    %12 = arith.addf %9, %11 : vector<128x16xf32>
    %c0_11 = arith.constant 0 : index
    %c0_12 = arith.constant 0 : index
    %13 = vector.load %arg6[%c0_11, %c0_12] : memref<128x16xf32, #tpu.memory_space<vmem>>, vector<128x16xf32>
    tpu.vector_store %arg6[%c0_11, %c0_12], %12 {strides = array<i32>} : memref<128x16xf32, #tpu.memory_space<vmem>>, vector<128x16xf32>,
    %14 = arith.mulf %12, %12 : vector<128x16xf32>
    %cst_13 = arith.constant dense<0.000000e+00> : vector<128xf32>
    %15 = vector.multi_reduction <add>, %14, %cst_13 [1] : vector<128x16xf32> to vector<128xf32>
    %16 = vector.shape_cast %15 : vector<128xf32> to vector<128x1xf32>
    %c0_14 = arith.constant 0 : index
    %c0_15 = arith.constant 0 : index
    %17 = vector.load %arg7[%c0_14, %c0_15] : memref<128x1xf32, #tpu.memory_space<vmem>>, vector<128x1xf32>
    tpu.vector_store %arg7[%c0_14, %c0_15], %16 {strides = array<i32>} : memref<128x1xf32, #tpu.memory_space<vmem>>, vector<128x1xf32>,
    return
  }
  func.func @transform_0(%arg0: i32) -> (i32, i32) {
    %c0_i32 = arith.constant 0 : i32
    %c0_i32_0 = arith.constant 0 : i32
    return %arg0, %c0_i32 : i32, i32
  }
  func.func @transform_1(%arg0: i32) -> (i32, i32) {
    %c0_i32 = arith.constant 0 : i32
    %c0_i32_0 = arith.constant 0 : i32
    %c0_i32_1 = arith.constant 0 : i32
    return %c0_i32, %c0_i32_0 : i32, i32
  }
  func.func @transform_2(%arg0: i32) -> (i32, i32) {
    %c0_i32 = arith.constant 0 : i32
    %c0_i32_0 = arith.constant 0 : i32
    %c0_i32_1 = arith.constant 0 : i32
    return %c0_i32, %c0_i32_0 : i32, i32
  }
  func.func @transform_3(%arg0: i32) -> (i32, i32) {
    %c0_i32 = arith.constant 0 : i32
    %c0_i32_0 = arith.constant 0 : i32
    %c0_i32_1 = arith.constant 0 : i32
    return %c0_i32, %c0_i32_0 : i32, i32
  }
  func.func @transform_4(%arg0: i32) -> (i32, i32) {
    %c0_i32 = arith.constant 0 : i32
    %c0_i32_0 = arith.constant 0 : i32
    %c0_i32_1 = arith.constant 0 : i32
    return %c0_i32, %c0_i32_0 : i32, i32
  }
  func.func @transform_5(%arg0: i32) -> (i32, i32) {
    %c0_i32 = arith.constant 0 : i32
    %c0_i32_0 = arith.constant 0 : i32
    return %arg0, %c0_i32 : i32, i32
  }
  func.func @transform_6(%arg0: i32) -> (i32, i32) {
    %c0_i32 = arith.constant 0 : i32
    %c0_i32_0 = arith.constant 0 : i32
    return %arg0, %c0_i32 : i32, i32
  }
}

</mosaic_0001>

<bundles_post_ra>
// kernel: tpu_custom_call.1
= control target key start
LH: loop header
LB: loop body
LE: loop exit
PB: predicated region body
PF: predicated region fallthrough
CT: control target
= control target key end

     0   :  { %s838_s21 = smov 0   ;;  %s1045_s0 = inlined_call_operand.vmem [shape: f32[512,32], index: 0, kind: input, shape index: {}]   ;;  %s1046_s1 = inlined_call_operand.vmem [shape: f32[32,32], index: 1, kind: input, shape index: {}]   ;;  %s1047_s2 = inlined_call_operand.vmem [shape: f32[1,32], index: 2, kind: input, shape index: {}]   ;;  %s1048_s3 = inlined_call_operand.vmem [shape: f32[32,16], index: 3, kind: input, shape index: {}]   ;;  %s1049_s4 = inlined_call_operand.vmem [shape: f32[1,16], index: 4, kind: input, shape index: {}]   ;;  %s1050_s5 = inlined_call_operand.vmem [shape: f32[512,16], index: 5, kind: output, shape index: {0}]   ;;  %s1051_s6 = inlined_call_operand.vmem [shape: f32[512,1], index: 6, kind: output, shape index: {1}]  }
   0x1 LB: > { %s732_s22 = sadd.s32 4294967295, %s801_s21   ;;  %p736_p0 = scmp.ge.s32.totalorder %s801_s21, 1  ;;  %s801_s21 = sphi %s838_s21, %s17_s21  }
   0x2   : > { %p216_p1 = scmp.lt.s32.totalorder %s801_s21, 5 }
   0x4   : > { %p217_p2 = pnand %p736_p0, %p216_p1 }
   0x5   : > { %s737_s27 = sshll.u32 (!%p217_p2), %s732_s22, 4 }
   0x6   : > { %220 = sbr.rel (%p217_p2) target bundleno = 465 (0x1d1), region = 40  ;;  %p252_p3 = scmp.lt.s32.totalorder (!%p217_p2), %s737_s27, 63 }
   0xb   : > { %v288_v0 = vld [vmem:[%s1046_s1 + $0x18] sm:$0xff]  ;;  %v287_v1 = vld [vmem:[%s1046_s1 + $0x10] sm:$0xff]  ;;  %v286_v2 = vld [vmem:[%s1046_s1 + $0x8] sm:$0xff]  ;;  %s1053_s27 = smov (!%p252_p3, %s737_s27), 63  ;;  %vm293_vm0 = vcmask 261120   ;;  %vm544_vm1 = vcmask 130048  }
   0xc   : > { %354 = vmatpush.msra.mxu0 %v288_v0  ;;  %777 = vmatpush.msra.mxu2 %v288_v0  ;;  %v285_v3 = vld [vmem:[%s1046_s1] sm:$0xff]  ;;  %s858_s8 = sshll.u32 %s1053_s27, 3  ;;  %v426_v12 = vld [vmem:[%s1048_s3 + $0x18] sm:$0xff]  ;;  %v425_v21 = vld [vmem:[%s1048_s3 + $0x10] sm:$0xff]  ;;  %vm625_vm2 = vcmask 7168  }
   0xd   : > { %s864_s11 = scalar_lea.vmem %s1045_s0, %s858_s8  ;;  %491 = vmatpush.msra.mxu1 %v426_v12  ;;  %781 = vmatpush.msra.mxu3 %v426_v12  ;;  %v424_v22 = vld [vmem:[%s1048_s3 + $0x8] sm:$0xff]  ;;  %v423_v23 = vld [vmem:[%s1048_s3] sm:$0xff]  ;;  %s938_s27 = scalar_lea.vmem %s1050_s5, %s858_s8 }
   0xe   : > { %355 = vmatpush.msra.mxu0 %v287_v1  ;;  %778 = vmatpush.msra.mxu2 %v287_v1  ;;  %v269_v4 = vld [vmem:[%s864_s11] sm:$0xff]  ;;  %v270_v6 = vld [vmem:[%s864_s11 + $0x8] sm:$0xff]  ;;  %v271_v8 = vld [vmem:[%s864_s11 + $0x10] sm:$0xff]  ;;  %s1008_s30 = scalar_lea.vmem %s1051_s6, %s858_s8 }
   0xf   : > { %v277_v5 = vld [vmem:[%s864_s11 + $0x40] sm:$0xff]  ;;  %v278_v7 = vld [vmem:[%s864_s11 + $0x48] sm:$0xff]  ;;  %v279_v9 = vld [vmem:[%s864_s11 + $0x50] sm:$0xff]  ;;  %492 = vmatpush.msra.mxu1 %v425_v21  ;;  %782 = vmatpush.msra.mxu3 %v425_v21 }
  0x10   : > { %356 = vmatpush.msra.mxu0 %v286_v2  ;;  %779 = vmatpush.msra.mxu2 %v286_v2  ;;  %v272_v10 = vld [vmem:[%s864_s11 + $0x18] sm:$0xff]  ;;  %v273_v13 = vld [vmem:[%s864_s11 + $0x20] sm:$0xff]  ;;  %v274_v15 = vld [vmem:[%s864_s11 + $0x28] sm:$0xff] }
  0x11   : > { %v280_v11 = vld [vmem:[%s864_s11 + $0x58] sm:$0xff]  ;;  %v281_v14 = vld [vmem:[%s864_s11 + $0x60] sm:$0xff]  ;;  %v282_v16 = vld [vmem:[%s864_s11 + $0x68] sm:$0xff]  ;;  %493 = vmatpush.msra.mxu1 %v424_v22  ;;  %783 = vmatpush.msra.mxu3 %v424_v22 }
  0x12   : > { %357 = vmatpush.msra.mxu0 %v285_v3  ;;  %780 = vmatpush.msra.mxu2 %v285_v3  ;;  %v275_v17 = vld [vmem:[%s864_s11 + $0x30] sm:$0xff]  ;;  %v276_v19 = vld [vmem:[%s864_s11 + $0x38] sm:$0xff]  ;;  %v793_v24 = vld [vmem:[%s1047_s2] ss:$0 sm:$0xff] }
  0x13   : > { %743 = vmatmul.msk.f32.vlgmr.msra.gmra.mxu0 %vm293_vm0, %v269_v4  ;;  %751 = vmatmul.msk.f32.vlgmr.msra.gmra.mxu2 %vm293_vm0, %v277_v5  ;;  %v283_v18 = vld [vmem:[%s864_s11 + $0x70] sm:$0xff]  ;;  %v284_v20 = vld [vmem:[%s864_s11 + $0x78] sm:$0xff] }
  0x14   : > { %494 = vmatpush.msra.mxu1 %v423_v23  ;;  %784 = vmatpush.msra.mxu3 %v423_v23 }
  0x1b   : > { %744 = vmatmul.msk.f32.gmra.mxu0 %vm293_vm0, %v270_v6  ;;  %752 = vmatmul.msk.f32.gmra.mxu2 %vm293_vm0, %v278_v7 }
  0x23   : > { %745 = vmatmul.msk.f32.gmra.mxu0 %vm293_vm0, %v271_v8  ;;  %753 = vmatmul.msk.f32.gmra.mxu2 %vm293_vm0, %v279_v9  ;;  %v932_v9 = vld [vmem:[%s1049_s4] ss:$0 sm:$0xff] }
  0x2b   : > { %746 = vmatmul.msk.f32.gmra.mxu0 %vm293_vm0, %v272_v10  ;;  %754 = vmatmul.msk.f32.gmra.mxu2 %vm293_vm0, %v280_v11 }
  0x33   : > { %747 = vmatmul.msk.f32.gmra.mxu0 %vm293_vm0, %v273_v13  ;;  %755 = vmatmul.msk.f32.gmra.mxu2 %vm293_vm0, %v281_v14 }
  0x3b   : > { %748 = vmatmul.msk.f32.gmra.mxu0 %vm293_vm0, %v274_v15  ;;  %756 = vmatmul.msk.f32.gmra.mxu2 %vm293_vm0, %v282_v16 }
  0x43   : > { %749 = vmatmul.msk.f32.gmra.mxu0 %vm293_vm0, %v275_v17  ;;  %757 = vmatmul.msk.f32.gmra.mxu2 %vm293_vm0, %v283_v18 }
  0x4b   : > { %750 = vmatmul.msk.f32.gmra.mxu0 %vm293_vm0, %v276_v19  ;;  %758 = vmatmul.msk.f32.gmra.mxu2 %vm293_vm0, %v284_v20 }
  0x90   : > { %v359_v25 = vpop.f32.mrf.mxu0 }
  0x91   : > { %v360_v26 = vadd.f32 %v793_v24, %v359_v25 }
  0x93   : > { %v407_v27 = vmax.f32 %v360_v26, 0.0 }
  0x95   : > { %759 = vmatmul.msk.f32.vlgmr.msra.gmra.mxu1 %vm293_vm0, %v407_v27 }
  0x96   : > { %v383_v28 = vpop.f32.mrf.mxu2 }
  0x97   : > { %v384_v29 = vadd.f32 %v793_v24, %v383_v28 }
  0x98   : > { %v362_v30 = vpop.f32.mrf.mxu0 }
  0x99   : > { %v415_v31 = vmax.f32 %v384_v29, 0.0  ;;  %v363_v32 = vadd.f32 %v793_v24, %v362_v30 }
  0x9b   : > { %v408_v33 = vmax.f32 %v363_v32, 0.0  ;;  %767 = vmatmul.msk.f32.vlgmr.msra.gmra.mxu3 %vm293_vm0, %v415_v31 }
  0x9d   : > { %760 = vmatmul.msk.f32.gmra.mxu1 %vm293_vm0, %v408_v33 }
  0x9e   : > { %v386_v34 = vpop.f32.mrf.mxu2 }
  0x9f   : > { %v387_v35 = vadd.f32 %v793_v24, %v386_v34 }
  0xa0   : > { %v365_v36 = vpop.f32.mrf.mxu0 }
  0xa1   : > { %v416_v37 = vmax.f32 %v387_v35, 0.0  ;;  %v366_v38 = vadd.f32 %v793_v24, %v365_v36 }
  0xa3   : > { %v409_v39 = vmax.f32 %v366_v38, 0.0  ;;  %768 = vmatmul.msk.f32.gmra.mxu3 %vm293_vm0, %v416_v37 }
  0xa5   : > { %761 = vmatmul.msk.f32.gmra.mxu1 %vm293_vm0, %v409_v39 }
  0xa6   : > { %v389_v40 = vpop.f32.mrf.mxu2 }
  0xa7   : > { %v390_v41 = vadd.f32 %v793_v24, %v389_v40 }
  0xa8   : > { %v368_v42 = vpop.f32.mrf.mxu0 }
  0xa9   : > { %v417_v43 = vmax.f32 %v390_v41, 0.0  ;;  %v369_v44 = vadd.f32 %v793_v24, %v368_v42 }
  0xab   : > { %v410_v45 = vmax.f32 %v369_v44, 0.0  ;;  %769 = vmatmul.msk.f32.gmra.mxu3 %vm293_vm0, %v417_v43 }
  0xad   : > { %762 = vmatmul.msk.f32.gmra.mxu1 %vm293_vm0, %v410_v45 }
  0xae   : > { %v392_v46 = vpop.f32.mrf.mxu2 }
  0xaf   : > { %v393_v47 = vadd.f32 %v793_v24, %v392_v46 }
  0xb0   : > { %v371_v48 = vpop.f32.mrf.mxu0 }
  0xb1   : > { %v418_v49 = vmax.f32 %v393_v47, 0.0  ;;  %v372_v50 = vadd.f32 %v793_v24, %v371_v48 }
  0xb3   : > { %v411_v51 = vmax.f32 %v372_v50, 0.0  ;;  %770 = vmatmul.msk.f32.gmra.mxu3 %vm293_vm0, %v418_v49 }
  0xb5   : > { %763 = vmatmul.msk.f32.gmra.mxu1 %vm293_vm0, %v411_v51 }
  0xb6   : > { %v395_v52 = vpop.f32.mrf.mxu2 }
  0xb7   : > { %v396_v53 = vadd.f32 %v793_v24, %v395_v52 }
  0xb8   : > { %v374_v54 = vpop.f32.mrf.mxu0 }
  0xb9   : > { %v419_v55 = vmax.f32 %v396_v53, 0.0  ;;  %v375_v56 = vadd.f32 %v793_v24, %v374_v54 }
  0xbb   : > { %v412_v57 = vmax.f32 %v375_v56, 0.0  ;;  %771 = vmatmul.msk.f32.gmra.mxu3 %vm293_vm0, %v419_v55 }
  0xbd   : > { %764 = vmatmul.msk.f32.gmra.mxu1 %vm293_vm0, %v412_v57 }
  0xbe   : > { %v398_v58 = vpop.f32.mrf.mxu2 }
  0xbf   : > { %v399_v59 = vadd.f32 %v793_v24, %v398_v58 }
  0xc0   : > { %v377_v60 = vpop.f32.mrf.mxu0 }
  0xc1   : > { %v420_v61 = vmax.f32 %v399_v59, 0.0  ;;  %v378_v62 = vadd.f32 %v793_v24, %v377_v60 }
  0xc3   : > { %v413_v63 = vmax.f32 %v378_v62, 0.0  ;;  %772 = vmatmul.msk.f32.gmra.mxu3 %vm293_vm0, %v420_v61 }
  0xc5   : > { %765 = vmatmul.msk.f32.gmra.mxu1 %vm293_vm0, %v413_v63 }
  0xc6   : > { %v401_v0 = vpop.f32.mrf.mxu2 }
  0xc7   : > { %v402_v1 = vadd.f32 %v793_v24, %v401_v0 }
  0xc8   : > { %v380_v2 = vpop.f32.mrf.mxu0 }
  0xc9   : > { %v421_v3 = vmax.f32 %v402_v1, 0.0  ;;  %v381_v4 = vadd.f32 %v793_v24, %v380_v2 }
  0xcb   : > { %v414_v5 = vmax.f32 %v381_v4, 0.0  ;;  %773 = vmatmul.msk.f32.gmra.mxu3 %vm293_vm0, %v421_v3 }
  0xcd   : > { %766 = vmatmul.msk.f32.gmra.mxu1 %vm293_vm0, %v414_v5 }
  0xce   : > { %v404_v6 = vpop.f32.mrf.mxu2 }
  0xcf   : > { %v405_v7 = vadd.f32 %v793_v24, %v404_v6 }
  0xd1   : > { %v422_v8 = vmax.f32 %v405_v7, 0.0 }
  0xd3   : > { %774 = vmatmul.msk.f32.gmra.mxu3 %vm293_vm0, %v422_v8 }
 0x112   : > { %v496_v10 = vpop.f32.mrf.mxu1 }
 0x113   : > { %v497_v11 = vadd.f32 %v932_v9, %v496_v10 }
 0x115   : > { %545 = vst.msk [vmem:[%s938_s27] sm:$0xff] %vm544_vm1, %v497_v11  ;;  %v561_v12 = vmul.f32 %v497_v11, %v497_v11 }
 0x117   : > { %v577_v13 = vsel %vm544_vm1, %v561_v12, 0.0 }
 0x118   : > { %578 = vadd.xlane.f32.xlu0 %v577_v13 }
 0x11a   : > { %v499_v14 = vpop.f32.mrf.mxu1 }
 0x11b   : > { %v500_v15 = vadd.f32 %v932_v9, %v499_v14 }
 0x11d   : > { %546 = vst.msk [vmem:[%s938_s27 + $0x8] sm:$0xff] %vm544_vm1, %v500_v15  ;;  %v562_v16 = vmul.f32 %v500_v15, %v500_v15 }
 0x11e   : > { %v520_v17 = vpop.f32.mrf.mxu3 }
 0x11f   : > { %v521_v18 = vadd.f32 %v932_v9, %v520_v17  ;;  %v580_v19 = vsel %vm544_vm1, %v562_v16, 0.0 }
 0x120   : > { %581 = vadd.xlane.f32.xlu0 %v580_v19 }
 0x121   : > { %553 = vst.msk [vmem:[%s938_s27 + $0x40] sm:$0xff] %vm544_vm1, %v521_v18  ;;  %v569_v20 = vmul.f32 %v521_v18, %v521_v18 }
 0x122   : > { %v502_v21 = vpop.f32.mrf.mxu1 }
 0x123   : > { %v503_v22 = vadd.f32 %v932_v9, %v502_v21  ;;  %v601_v23 = vsel %vm544_vm1, %v569_v20, 0.0 }
 0x124   : > { %602 = vadd.xlane.f32.xlu2 %v601_v23 }
 0x125   : > { %547 = vst.msk [vmem:[%s938_s27 + $0x10] sm:$0xff] %vm544_vm1, %v503_v22  ;;  %v563_v24 = vmul.f32 %v503_v22, %v503_v22 }
 0x126   : > { %v523_v25 = vpop.f32.mrf.mxu3 }
 0x127   : > { %v524_v26 = vadd.f32 %v932_v9, %v523_v25  ;;  %v583_v27 = vsel %vm544_vm1, %v563_v24, 0.0 }
 0x128   : > { %584 = vadd.xlane.f32.xlu1 %v583_v27 }
 0x129   : > { %554 = vst.msk [vmem:[%s938_s27 + $0x48] sm:$0xff] %vm544_vm1, %v524_v26  ;;  %v570_v28 = vmul.f32 %v524_v26, %v524_v26 }
 0x12a   : > { %v505_v29 = vpop.f32.mrf.mxu1 }
 0x12b   : > { %v506_v30 = vadd.f32 %v932_v9, %v505_v29  ;;  %v604_v31 = vsel %vm544_vm1, %v570_v28, 0.0 }
 0x12c   : > { %605 = vadd.xlane.f32.xlu0 %v604_v31 }
 0x12d   : > { %548 = vst.msk [vmem:[%s938_s27 + $0x18] sm:$0xff] %vm544_vm1, %v506_v30  ;;  %v564_v32 = vmul.f32 %v506_v30, %v506_v30 }
 0x12e   : > { %v526_v33 = vpop.f32.mrf.mxu3 }
 0x12f   : > { %v527_v34 = vadd.f32 %v932_v9, %v526_v33  ;;  %v586_v35 = vsel %vm544_vm1, %v564_v32, 0.0 }
 0x130   : > { %587 = vadd.xlane.f32.xlu1 %v586_v35 }
 0x131   : > { %555 = vst.msk [vmem:[%s938_s27 + $0x50] sm:$0xff] %vm544_vm1, %v527_v34  ;;  %v571_v38 = vmul.f32 %v527_v34, %v527_v34 }
 0x132   : > { %v508_v36 = vpop.f32.mrf.mxu1 }
 0x133   : > { %v509_v37 = vadd.f32 %v932_v9, %v508_v36  ;;  %v607_v43 = vsel %vm544_vm1, %v571_v38, 0.0 }
 0x135   : > { %549 = vst.msk [vmem:[%s938_s27 + $0x20] sm:$0xff] %vm544_vm1, %v509_v37  ;;  %v565_v39 = vmul.f32 %v509_v37, %v509_v37 }
 0x136   : > { %v529_v40 = vpop.f32.mrf.mxu3 }
 0x137   : > { %v530_v41 = vadd.f32 %v932_v9, %v529_v40  ;;  %v589_v42 = vsel %vm544_vm1, %v565_v39, 0.0 }
 0x138   : > { %590 = vadd.xlane.f32.xlu2 %v589_v42  ;;  %608 = vadd.xlane.f32.xlu1 %v607_v43 }
 0x139   : > { %556 = vst.msk [vmem:[%s938_s27 + $0x58] sm:$0xff] %vm544_vm1, %v530_v41  ;;  %v572_v46 = vmul.f32 %v530_v41, %v530_v41 }
 0x13a   : > { %v511_v44 = vpop.f32.mrf.mxu1 }
 0x13b   : > { %v512_v45 = vadd.f32 %v932_v9, %v511_v44  ;;  %v610_v49 = vsel %vm544_vm1, %v572_v46, 0.0 }
 0x13d   : > { %550 = vst.msk [vmem:[%s938_s27 + $0x28] sm:$0xff] %vm544_vm1, %v512_v45  ;;  %v566_v54 = vmul.f32 %v512_v45, %v512_v45 }
 0x13e   : > { %v532_v47 = vpop.f32.mrf.mxu3 }
 0x13f   : > { %v533_v48 = vadd.f32 %v932_v9, %v532_v47  ;;  %v592_v58 = vsel %vm544_vm1, %v566_v54, 0.0 }
 0x140   : > { %611 = vadd.xlane.f32.xlu2 %v610_v49 }
 0x141   : > { %557 = vst.msk [vmem:[%s938_s27 + $0x60] sm:$0xff] %vm544_vm1, %v533_v48  ;;  %v573_v50 = vmul.f32 %v533_v48, %v533_v48 }
 0x142   : > { %v514_v51 = vpop.f32.mrf.mxu1 }
 0x143   : > { %v515_v52 = vadd.f32 %v932_v9, %v514_v51  ;;  %v613_v53 = vsel %vm544_vm1, %v573_v50, 0.0 }
 0x144   : > { %614 = vadd.xlane.f32.xlu0 %v613_v53 }
 0x145   : > { %551 = vst.msk [vmem:[%s938_s27 + $0x30] sm:$0xff] %vm544_vm1, %v515_v52  ;;  %v567_v55 = vmul.f32 %v515_v52, %v515_v52 }
 0x146   : > { %v535_v56 = vpop.f32.mrf.mxu3 }
 0x147   : > { %v536_v57 = vadd.f32 %v932_v9, %v535_v56  ;;  %v595_v59 = vsel %vm544_vm1, %v567_v55, 0.0 }
 0x148   : > { %593 = vadd.xlane.f32.xlu2 %v592_v58 }
 0x149   : > { %558 = vst.msk [vmem:[%s938_s27 + $0x68] sm:$0xff] %vm544_vm1, %v536_v57  ;;  %v574_v4 = vmul.f32 %v536_v57, %v536_v57 }
 0x14a   : > { %v517_v60 = vpop.f32.mrf.mxu1 }
 0x14b   : > { %v518_v61 = vadd.f32 %v932_v9, %v517_v60  ;;  %v616_v7 = vsel %vm544_vm1, %v574_v4, 0.0 }
 0x14c   : > { %596 = vadd.xlane.f32.xlu0 %v595_v59 }
 0x14d   : > { %552 = vst.msk [vmem:[%s938_s27 + $0x38] sm:$0xff] %vm544_vm1, %v518_v61  ;;  %v568_v62 = vmul.f32 %v518_v61, %v518_v61 }
 0x14e   : > { %v538_v63 = vpop.f32.mrf.mxu3 }
 0x14f   : > { %v539_v0 = vadd.f32 %v932_v9, %v538_v63  ;;  %v598_v1 = vsel %vm544_vm1, %v568_v62, 0.0 }
 0x150   : > { %599 = vadd.xlane.f32.xlu1 %v598_v1 }
 0x151   : > { %559 = vst.msk [vmem:[%s938_s27 + $0x70] sm:$0xff] %vm544_vm1, %v539_v0  ;;  %v575_v2 = vmul.f32 %v539_v0, %v539_v0 }
 0x153   : > { %v619_v3 = vsel %vm544_vm1, %v575_v2, 0.0 }
 0x154   : > { %620 = vadd.xlane.f32.xlu2 %v619_v3 }
 0x156   : > { %v541_v5 = vpop.f32.mrf.mxu3 }
 0x157   : > { %v542_v6 = vadd.f32 %v932_v9, %v541_v5 }
 0x158   : > { %617 = vadd.xlane.f32.xlu1 %v616_v7 }
 0x159   : > { %560 = vst.msk [vmem:[%s938_s27 + $0x78] sm:$0xff] %vm544_vm1, %v542_v6  ;;  %v576_v8 = vmul.f32 %v542_v6, %v542_v6 }
 0x15b   : > { %v622_v10 = vsel %vm544_vm1, %v576_v8, 0.0 }
 0x15c   : > { %623 = vadd.xlane.f32.xlu0 %v622_v10 }
 0x18b   : > { %v579_v9 = vpop.xlane.xlu0 %578 }
 0x18c   : > { %626 = vst.msk [vmem:[%s1008_s30] sm:$0xff] %vm625_vm2, %v579_v9 }
 0x193   : > { %v582_v11 = vpop.xlane.xlu0 %581 }
 0x194   : > { %627 = vst.msk [vmem:[%s1008_s30 + $0x8] sm:$0xff] %vm625_vm2, %v582_v11 }
 0x197   : > { %v603_v12 = vpop.xlane.xlu2 %602 }
 0x198   : > { %634 = vst.msk [vmem:[%s1008_s30 + $0x40] sm:$0xff] %vm625_vm2, %v603_v12 }
 0x19b   : > { %v585_v13 = vpop.xlane.xlu1 %584 }
 0x19c   : > { %628 = vst.msk [vmem:[%s1008_s30 + $0x10] sm:$0xff] %vm625_vm2, %v585_v13 }
 0x19f   : > { %v606_v14 = vpop.xlane.xlu0 %605 }
 0x1a0   : > { %635 = vst.msk [vmem:[%s1008_s30 + $0x48] sm:$0xff] %vm625_vm2, %v606_v14 }
 0x1a3   : > { %v588_v15 = vpop.xlane.xlu1 %587 }
 0x1a4   : > { %629 = vst.msk [vmem:[%s1008_s30 + $0x18] sm:$0xff] %vm625_vm2, %v588_v15 }
 0x1ab   : > { %v591_v16 = vpop.xlane.xlu2 %590  ;;  %v609_v17 = vpop.xlane.xlu1 %608 }
 0x1ac   : > { %630 = vst.msk [vmem:[%s1008_s30 + $0x20] sm:$0xff] %vm625_vm2, %v591_v16 }
 0x1ad   : > { %636 = vst.msk [vmem:[%s1008_s30 + $0x50] sm:$0xff] %vm625_vm2, %v609_v17 }
 0x1b3   : > { %v612_v18 = vpop.xlane.xlu2 %611 }
 0x1b4   : > { %637 = vst.msk [vmem:[%s1008_s30 + $0x58] sm:$0xff] %vm625_vm2, %v612_v18 }
 0x1b7   : > { %v615_v19 = vpop.xlane.xlu0 %614 }
 0x1b8   : > { %638 = vst.msk [vmem:[%s1008_s30 + $0x60] sm:$0xff] %vm625_vm2, %v615_v19 }
 0x1bb   : > { %v594_v20 = vpop.xlane.xlu2 %593 }
 0x1bc   : > { %631 = vst.msk [vmem:[%s1008_s30 + $0x28] sm:$0xff] %vm625_vm2, %v594_v20 }
 0x1bf   : > { %v597_v21 = vpop.xlane.xlu0 %596 }
 0x1c0   : > { %632 = vst.msk [vmem:[%s1008_s30 + $0x30] sm:$0xff] %vm625_vm2, %v597_v21 }
 0x1c3   : > { %v600_v22 = vpop.xlane.xlu1 %599 }
 0x1c4   : > { %633 = vst.msk [vmem:[%s1008_s30 + $0x38] sm:$0xff] %vm625_vm2, %v600_v22 }
 0x1c7   : > { %v621_v23 = vpop.xlane.xlu2 %620 }
 0x1c8   : > { %640 = vst.msk [vmem:[%s1008_s30 + $0x70] sm:$0xff] %vm625_vm2, %v621_v23 }
 0x1cb   : > { %v618_v24 = vpop.xlane.xlu1 %617 }
 0x1cc   : > { %639 = vst.msk [vmem:[%s1008_s30 + $0x68] sm:$0xff] %vm625_vm2, %v618_v24 }
 0x1cf   : > { %v624_v25 = vpop.xlane.xlu0 %623 }
 0x1d0   : > { %641 = vst.msk [vmem:[%s1008_s30 + $0x78] sm:$0xff] %vm625_vm2, %v624_v25 }
 0x1d1 PF: > { %s17_s21 = sadd.s32 1, %s801_s21  }
 0x1d2   : > { %p14_p4 = scmp.ge.s32.totalorder %s17_s21, 6  }
 0x1d4   :  { %16 = sbr.rel (!%p14_p4) target bundleno = 1 (0x1), region = 82 }

</bundles_post_ra>
